<compile_context>
chip_gen: v5e
topology: v5e:2x2
jax: 0.10.0
libtpu: 0.0.40
codegen_flags: <defaults>
</compile_context>

<pallas_src>
import jax
import jax.numpy as jnp
from jax import lax
from jax.experimental import pallas as pl
from jax.experimental.pallas import tpu as pltpu


def _linear_kernel(x_ref, w_ref, b_ref, o_ref, acc_ref):
    # x_ref: (tm, tk)  w_ref: (tn, tk)  b_ref: (1, tn)  o_ref: (tm, tn)
    k = pl.program_id(2)

    @pl.when(k == 0)
    def _():
        acc_ref[...] = jnp.zeros_like(acc_ref)

    # y = x @ W^T : contract the last dim of both operands. The MXU handles
    # the transposed RHS natively, so no transpose is ever materialized.
    acc_ref[...] += lax.dot_general(
        x_ref[...],
        w_ref[...],
        dimension_numbers=(((1,), (1,)), ((), ())),
        preferred_element_type=jnp.float32,
    )

    @pl.when(k == pl.num_programs(2) - 1)
    def _():
        # Bias add in f32, single cast to the output dtype at the end.
        o_ref[...] = (acc_ref[...] + b_ref[...].astype(jnp.float32)).astype(o_ref.dtype)


def _round_up(x, m):
    return ((x + m - 1) // m) * m


def single_head_classification(inpt, weight, bias, *, compute_dtype=None):
    """Forward of SingleHeadClassification: returns [inpt @ weight.T + bias].

    inpt:   (B, input_dim)
    weight: (output_dim, input_dim)   (PyTorch nn.Linear layout, used as-is)
    bias:   (output_dim,)
    compute_dtype: optionally cast x/weight (e.g. jnp.bfloat16) for large
                   heads; accumulation and bias add stay in f32.
    """
    B, K = inpt.shape
    N, K2 = weight.shape
    assert K == K2, "weight must be (output_dim, input_dim)"

    # --- tile plan -----------------------------------------------------------
    # Lane-dense output: pad output_dim up to a multiple of 128 lanes.
    Np = _round_up(N, 128)
    # Row tile: big multiple of 8; collapse to a single block for small B.
    tm = B if B <= 256 else 256
    # N tile: multiple of 128 lanes.
    tn = Np if Np <= 512 else 512
    # K tile: single step for moderate K; otherwise 512-wide chunks,
    # zero-padded so the reduction never sees uninitialized edge data.
    if K <= 1024:
        tk, Kp = K, K
    else:
        tk = 512
        Kp = _round_up(K, tk)

    # --- wrapper-side padding / dtype glue ----------------------------------
    x = inpt
    w = weight
    b = bias
    if Kp != K:
        x = jnp.pad(x, ((0, 0), (0, Kp - K)))
        w = jnp.pad(w, ((0, 0), (0, Kp - K)))
    if Np != N:
        w = jnp.pad(w, ((0, Np - N), (0, 0)))   # zero rows -> zero extra outputs
        b = jnp.pad(b, ((0, Np - N),))
    if compute_dtype is not None:
        x = x.astype(compute_dtype)
        w = w.astype(compute_dtype)
    b2d = b.reshape(1, Np).astype(jnp.float32)

    grid = (pl.cdiv(B, tm), pl.cdiv(Np, tn), pl.cdiv(Kp, tk))

    out = pl.pallas_call(
        _linear_kernel,
        out_shape=jax.ShapeDtypeStruct((B, Np), inpt.dtype),
        grid_spec=pltpu.PrefetchScalarGridSpec(
            num_scalar_prefetch=0,
            grid=grid,
            in_specs=[
                pl.BlockSpec((tm, tk), lambda i, j, k: (i, k)),   # x tile
                pl.BlockSpec((tn, tk), lambda i, j, k: (j, k)),   # W tile (native layout)
                pl.BlockSpec((1, tn), lambda i, j, k: (0, j)),    # bias tile
            ],
            out_specs=pl.BlockSpec((tm, tn), lambda i, j, k: (i, j)),
            scratch_shapes=[pltpu.VMEM((tm, tn), jnp.float32)],
        ),
        compiler_params=pltpu.CompilerParams(
            dimension_semantics=("parallel", "parallel", "arbitrary"),
            vmem_limit_bytes=48 * 1024 * 1024,  # well under v7x's 64 MiB VMEM
        ),
    )(x, w, b2d)

    if Np != N:
        out = out[:, :N]
    return [out]  # PyTorch forward returns a list [op1]


if __name__ == "__main__":
    # Small shapes consistent with the module: batch=8, input_dim=32, output_dim=16
    batch, input_dim, output_dim = 8, 32, 16

    key = jax.random.PRNGKey(0)
    k_x, k_w, k_b = jax.random.split(key, 3)

    x = jax.random.normal(k_x, (batch, input_dim), dtype=jnp.float32)
    # Deterministic "init" mimicking nn.Linear's uniform(-1/sqrt(in), 1/sqrt(in))
    bound = 1.0 / (input_dim ** 0.5)
    weight = jax.random.uniform(
        k_w, (output_dim, input_dim), minval=-bound, maxval=bound, dtype=jnp.float32
    )
    bias = jax.random.uniform(
        k_b, (output_dim,), minval=-bound, maxval=bound, dtype=jnp.float32
    )

    outs = single_head_classification(x, weight, bias)
    op1 = jax.block_until_ready(outs[0])

    # Reference check in plain JAX
    ref = x @ weight.T + bias
    assert op1.shape == (batch, output_dim)
    assert jnp.allclose(op1, ref, atol=1e-5, rtol=1e-5)

    print("KERNEL_OK")
</pallas_src>

<mosaic_0001>
module attributes {stable_mosaic.version = 11 : i64} {
  func.func @_linear_kernel(%arg0: i32, %arg1: i32, %arg2: i32, %arg3: memref<8x32xf32, #tpu.memory_space<vmem>>, %arg4: memref<128x32xf32, #tpu.memory_space<vmem>>, %arg5: memref<1x128xf32, #tpu.memory_space<vmem>>, %arg6: memref<8x128xf32, #tpu.memory_space<vmem>>, %arg7: memref<8x128xf32, #tpu.memory_space<vmem>>) attributes {dimension_semantics = [#tpu.dimension_semantics<parallel>, #tpu.dimension_semantics<parallel>, #tpu.dimension_semantics<arbitrary>], iteration_bounds = array<i64: 1, 1, 1>, scalar_prefetch = 0 : i64, scratch_operands = 1 : i64, tpu.core_type = #tpu.core_type<tc>, window_params = [{transform_indices = @transform_0, window_bounds = array<i64: 8, 32>}, {transform_indices = @transform_1, window_bounds = array<i64: 128, 32>}, {transform_indices = @transform_2, window_bounds = array<i64: 1, 128>}, {transform_indices = @transform_3, window_bounds = array<i64: 8, 128>}]} {
    %c0_i32 = arith.constant 0 : i32
    %0 = arith.cmpi eq, %arg2, %c0_i32 : i32
    %1 = arith.extui %0 : i1 to i32
    %c0_i32_0 = arith.constant 0 : i32
    %2 = arith.cmpi ne, %1, %c0_i32_0 : i32
    scf.if %2 {
      %cst_10 = arith.constant 0.000000e+00 : f32
      %12 = vector.broadcast %cst_10 : f32 to vector<8x128xf32>
      %c0_11 = arith.constant 0 : index
      %c0_12 = arith.constant 0 : index
      %13 = vector.load %arg7[%c0_11, %c0_12] : memref<8x128xf32, #tpu.memory_space<vmem>>, vector<8x128xf32>
      tpu.vector_store %arg7[%c0_11, %c0_12], %12 {strides = array<i32>} : memref<8x128xf32, #tpu.memory_space<vmem>>, vector<8x128xf32>,
    } else {
    }
    %c0 = arith.constant 0 : index
    %c0_1 = arith.constant 0 : index
    %3 = vector.load %arg7[%c0, %c0_1] : memref<8x128xf32, #tpu.memory_space<vmem>>, vector<8x128xf32>
    %c0_2 = arith.constant 0 : index
    %c0_3 = arith.constant 0 : index
    %4 = vector.load %arg3[%c0_2, %c0_3] : memref<8x32xf32, #tpu.memory_space<vmem>>, vector<8x32xf32>
    %c0_4 = arith.constant 0 : index
    %c0_5 = arith.constant 0 : index
    %5 = vector.load %arg4[%c0_4, %c0_5] : memref<128x32xf32, #tpu.memory_space<vmem>>, vector<128x32xf32>
    %cst = arith.constant dense<0.000000e+00> : vector<8x128xf32>
    %6 = tpu.matmul %4, %5, %cst {dimension_numbers = #tpu.dot_dimension_numbers<[1], [1], [0], [0], [0, 0, 1, 0], [], []>} : vector<8x32xf32>, vector<128x32xf32>, vector<8x128xf32> -> vector<8x128xf32>
    %7 = arith.addf %3, %6 : vector<8x128xf32>
    %c0_6 = arith.constant 0 : index
    %c0_7 = arith.constant 0 : index
    %8 = vector.load %arg7[%c0_6, %c0_7] : memref<8x128xf32, #tpu.memory_space<vmem>>, vector<8x128xf32>
    tpu.vector_store %arg7[%c0_6, %c0_7], %7 {strides = array<i32>} : memref<8x128xf32, #tpu.memory_space<vmem>>, vector<8x128xf32>,
    %c0_i32_8 = arith.constant 0 : i32
    %9 = arith.cmpi eq, %arg2, %c0_i32_8 : i32
    %10 = arith.extui %9 : i1 to i32
    %c0_i32_9 = arith.constant 0 : i32
    %11 = arith.cmpi ne, %10, %c0_i32_9 : i32
    scf.if %11 {
      %c0_10 = arith.constant 0 : index
      %c0_11 = arith.constant 0 : index
      %12 = vector.load %arg7[%c0_10, %c0_11] : memref<8x128xf32, #tpu.memory_space<vmem>>, vector<8x128xf32>
      %c0_12 = arith.constant 0 : index
      %c0_13 = arith.constant 0 : index
      %13 = vector.load %arg5[%c0_12, %c0_13] : memref<1x128xf32, #tpu.memory_space<vmem>>, vector<1x128xf32>
      %14 = vector.broadcast %13 : vector<1x128xf32> to vector<8x128xf32>
      %15 = arith.addf %12, %14 : vector<8x128xf32>
      %c0_14 = arith.constant 0 : index
      %c0_15 = arith.constant 0 : index
      %16 = vector.load %arg6[%c0_14, %c0_15] : memref<8x128xf32, #tpu.memory_space<vmem>>, vector<8x128xf32>
      tpu.vector_store %arg6[%c0_14, %c0_15], %15 {strides = array<i32>} : memref<8x128xf32, #tpu.memory_space<vmem>>, vector<8x128xf32>,
    } else {
    }
    return
  }
  func.func @transform_0(%arg0: i32, %arg1: i32, %arg2: i32) -> (i32, i32) {
    %c0_i32 = arith.constant 0 : i32
    return %arg0, %arg2 : i32, i32
  }
  func.func @transform_1(%arg0: i32, %arg1: i32, %arg2: i32) -> (i32, i32) {
    %c0_i32 = arith.constant 0 : i32
    return %arg1, %arg2 : i32, i32
  }
  func.func @transform_2(%arg0: i32, %arg1: i32, %arg2: i32) -> (i32, i32) {
    %c0_i32 = arith.constant 0 : i32
    %c0_i32_0 = arith.constant 0 : i32
    return %c0_i32, %arg1 : i32, i32
  }
  func.func @transform_3(%arg0: i32, %arg1: i32, %arg2: i32) -> (i32, i32) {
    %c0_i32 = arith.constant 0 : i32
    return %arg0, %arg1 : i32, i32
  }
}

</mosaic_0001>

<bundles_post_ra>
// kernel: tpu_custom_call.1
= control target key start
LH: loop header
LB: loop body
LE: loop exit
PB: predicated region body
PF: predicated region fallthrough
CT: control target
= control target key end

     0   :  { %vm38_vm0 = vcmask 261120   ;;  %s278_s0 = inlined_call_operand.vmem [shape: f32[8,32], index: 0, kind: input, shape index: {}]   ;;  %s279_s1 = inlined_call_operand.vmem [shape: f32[128,32], index: 1, kind: input, shape index: {}]   ;;  %s280_s2 = inlined_call_operand.vmem [shape: f32[1,128], index: 2, kind: input, shape index: {}]   ;;  %s281_s3 = inlined_call_operand.hbm [shape: f32[8,128], index: 3, kind: output, shape index: {}]  }
   0x1   :  { %v37_v0 = vld [vmem:[%s279_s1 + $0x78] sm:$0xff]  ;;  %v36_v1 = vld [vmem:[%s279_s1 + $0x70] sm:$0xff] }
   0x2   :  { %138 = vmatpush.xpose.msk.msra.mxu0 %vm38_vm0, %v37_v0 }
   0x3   :  { %8 = vsyncpa [#allocation4], 0  ;;  %v35_v2 = vld [vmem:[%s279_s1 + $0x68] sm:$0xff]  ;;  %v34_v3 = vld [vmem:[%s279_s1 + $0x60] sm:$0xff]  ;;  %s183_s21 = smov [#allocation3]   ;;  %s129_s25 = sshll.u32 %s281_s3, 4  ;;  %s130_s25 = int_to_ptr.hbm [resolvable:$true] %s129_s25 }
   0x4   :  { %v33_v4 = vld [vmem:[%s279_s1 + $0x58] sm:$0xff]  ;;  %v32_v5 = vld [vmem:[%s279_s1 + $0x50] sm:$0xff]  ;;  %v31_v6 = vld [vmem:[%s279_s1 + $0x48] sm:$0xff]  ;;  %s127_s22 = sshll.u32 %s183_s21, 4  ;;  %s128_s22 = int_to_ptr.vmem [resolvable:$true] %s127_s22 }
   0x5   :  { %v30_v7 = vld [vmem:[%s279_s1 + $0x40] sm:$0xff]  ;;  %v29_v8 = vld [vmem:[%s279_s1 + $0x38] sm:$0xff]  ;;  %v28_v9 = vld [vmem:[%s279_s1 + $0x30] sm:$0xff] }
   0x6   :  { %139 = vmatpush.xpose.msk.msra.mxu0 %vm38_vm0, %v36_v1  ;;  %v27_v10 = vld [vmem:[%s279_s1 + $0x28] sm:$0xff]  ;;  %v26_v11 = vld [vmem:[%s279_s1 + $0x20] sm:$0xff]  ;;  %v25_v12 = vld [vmem:[%s279_s1 + $0x18] sm:$0xff] }
   0x7   :  { %v24_v13 = vld [vmem:[%s279_s1 + $0x10] sm:$0xff]  ;;  %v23_v14 = vld [vmem:[%s279_s1 + $0x8] sm:$0xff]  ;;  %v22_v15 = vld [vmem:[%s279_s1] sm:$0xff] }
   0x8   :  { %v21_v16 = vld [vmem:[%s278_s0] sm:$0xff] }
   0x9   :  { %v156_v17 = vld [vmem:[%s280_s2] ss:$0 sm:$0xff] }
   0xa   :  { %140 = vmatpush.xpose.msk.msra.mxu0 %vm38_vm0, %v35_v2 }
   0xe   :  { %141 = vmatpush.xpose.msk.msra.mxu0 %vm38_vm0, %v34_v3 }
  0x12   :  { %142 = vmatpush.xpose.msk.msra.mxu0 %vm38_vm0, %v33_v4 }
  0x16   :  { %143 = vmatpush.xpose.msk.msra.mxu0 %vm38_vm0, %v32_v5 }
  0x1a   :  { %144 = vmatpush.xpose.msk.msra.mxu0 %vm38_vm0, %v31_v6 }
  0x1e   :  { %145 = vmatpush.xpose.msk.msra.mxu0 %vm38_vm0, %v30_v7 }
  0x22   :  { %146 = vmatpush.xpose.msk.msra.mxu0 %vm38_vm0, %v29_v8 }
  0x26   :  { %147 = vmatpush.xpose.msk.msra.mxu0 %vm38_vm0, %v28_v9 }
  0x2a   :  { %148 = vmatpush.xpose.msk.msra.mxu0 %vm38_vm0, %v27_v10 }
  0x2e   :  { %149 = vmatpush.xpose.msk.msra.mxu0 %vm38_vm0, %v26_v11 }
  0x32   :  { %150 = vmatpush.xpose.msk.msra.mxu0 %vm38_vm0, %v25_v12 }
  0x36   :  { %151 = vmatpush.xpose.msk.msra.mxu0 %vm38_vm0, %v24_v13 }
  0x3a   :  { %152 = vmatpush.xpose.msk.msra.mxu0 %vm38_vm0, %v23_v14 }
  0x3e   :  { %153 = vmatpush.xpose.msk.msra.mxu0 %vm38_vm0, %v22_v15 }
  0x41   :  { %154 = vmatmul.msk.f32.vlgmr.msra.gmra.mxu0 %vm38_vm0, %v21_v16 }
  0xbe   :  { %v107_v18 = vpop.f32.mrf.mxu0 }
  0xbf   :  { %v120_v19 = vadd.f32 %v156_v17, %v107_v18 }
  0xc1   :  { %121 = vst [vmem:[#allocation3] sm:$0xff] %v120_v19 }
  0xc2   :  { %132 = dma.vmem_to_hbm [thread:$0]  %s128_s22, 128, %s130_s25, [#allocation4]  }
  0xc3   :  { %181 = dma.done.wait [#allocation4], 128  }
  0xc4   :  { %182 = vsyncadd [#allocation4], 4294967168 }
  0xc5   :  { %137 = vsyncpa [#allocation4], 1 }

</bundles_post_ra>
